<compile_context>
chip_gen: v5e
topology: v5e:2x2
jax: 0.10.0
libtpu: 0.0.40
codegen_flags: <defaults>
</compile_context>

<pallas_src>
import jax
import jax.numpy as jnp
from jax.experimental import pallas as pl
from jax.experimental.pallas import tpu as pltpu

LANES = 128
SUBLANES = 8
BLOCK_ROWS = 2048  # 2048 x 128 f32 = 1 MiB per input per pipeline buffer


def manhattan_distance(x_1, x_2):
    """Pallas implementation of torch.norm(x_1 - x_2) -> scalar."""
    assert x_1.shape == x_2.shape, "inputs must have the same shape"
    out_dtype = jnp.result_type(x_1.dtype, x_2.dtype)

    xf = jnp.ravel(x_1)
    yf = jnp.ravel(x_2)
    n = xf.shape[0]

    # Main slab: largest prefix whose row count (n // 128) is a multiple of 8.
    rows_full = n // LANES
    rows_main = (rows_full // SUBLANES) * SUBLANES
    main_len = rows_main * LANES

    total = jnp.float32(0.0)

    if rows_main > 0:
        block_rows = min(BLOCK_ROWS, rows_main)  # either 2048 or full extent
        num_blocks = pl.cdiv(rows_main, block_rows)
        needs_mask = (rows_main % block_rows) != 0  # ragged last grid block

        x2d = xf[:main_len].reshape(rows_main, LANES)
        y2d = yf[:main_len].reshape(rows_main, LANES)

        def kernel(x_ref, y_ref, o_ref):
            x = x_ref[...].astype(jnp.float32)
            y = y_ref[...].astype(jnp.float32)
            d = x - y
            sq = d * d
            if needs_mask:
                # Zero out rows of the (partially out-of-bounds) last block.
                row = jax.lax.broadcasted_iota(jnp.int32, sq.shape, 0)
                valid = (pl.program_id(0) * block_rows + row) < rows_main
                sq = jnp.where(valid, sq, 0.0)
            # Pure-VPU reduction: fold groups of 8 rows onto one (8,128) vreg.
            o_ref[...] = jnp.sum(
                sq.reshape(block_rows // SUBLANES, SUBLANES, LANES), axis=0
            )

        partials = pl.pallas_call(
            kernel,
            out_shape=jax.ShapeDtypeStruct(
                (num_blocks * SUBLANES, LANES), jnp.float32
            ),
            grid_spec=pltpu.PrefetchScalarGridSpec(
                num_scalar_prefetch=0,
                grid=(num_blocks,),
                in_specs=[
                    pl.BlockSpec((block_rows, LANES), lambda i: (i, 0)),
                    pl.BlockSpec((block_rows, LANES), lambda i: (i, 0)),
                ],
                out_specs=pl.BlockSpec((SUBLANES, LANES), lambda i: (i, 0)),
            ),
            compiler_params=pltpu.CompilerParams(
                dimension_semantics=("parallel",),
            ),
        )(x2d, y2d)

        total = total + jnp.sum(partials)

    # Tiny tail (< 8*128 elements) that didn't fit the lane-dense slab.
    if main_len < n:
        xt = xf[main_len:].astype(jnp.float32)
        yt = yf[main_len:].astype(jnp.float32)
        dt = xt - yt
        total = total + jnp.sum(dt * dt)

    return jnp.sqrt(total).astype(out_dtype)


if __name__ == "__main__":
    key = jax.random.PRNGKey(0)
    k1, k2 = jax.random.split(key)
    # Small NCHW-like inputs (module accepts any shape).
    x_1 = jax.random.normal(k1, (2, 4, 16, 16), dtype=jnp.float32)
    x_2 = jax.random.normal(k2, (2, 4, 16, 16), dtype=jnp.float32)

    result = manhattan_distance(x_1, x_2)
    result = jax.block_until_ready(result)

    # Reference check in plain JAX.
    ref = jnp.sqrt(jnp.sum((x_1 - x_2) ** 2))
    assert jnp.allclose(result, ref, rtol=1e-5, atol=1e-5), (result, ref)

    print("KERNEL_OK")
</pallas_src>

<mosaic_0001>
module attributes {stable_mosaic.version = 11 : i64} {
  func.func @kernel(%arg0: i32, %arg1: memref<16x128xf32, #tpu.memory_space<vmem>>, %arg2: memref<16x128xf32, #tpu.memory_space<vmem>>, %arg3: memref<8x128xf32, #tpu.memory_space<vmem>>) attributes {dimension_semantics = [#tpu.dimension_semantics<parallel>], iteration_bounds = array<i64: 1>, scalar_prefetch = 0 : i64, scratch_operands = 0 : i64, tpu.core_type = #tpu.core_type<tc>, window_params = [{transform_indices = @transform_0, window_bounds = array<i64: 16, 128>}, {transform_indices = @transform_1, window_bounds = array<i64: 16, 128>}, {transform_indices = @transform_2, window_bounds = array<i64: 8, 128>}]} {
    %c0 = arith.constant 0 : index
    %c0_0 = arith.constant 0 : index
    %0 = vector.load %arg1[%c0, %c0_0] : memref<16x128xf32, #tpu.memory_space<vmem>>, vector<16x128xf32>
    %c0_1 = arith.constant 0 : index
    %c0_2 = arith.constant 0 : index
    %1 = vector.load %arg2[%c0_1, %c0_2] : memref<16x128xf32, #tpu.memory_space<vmem>>, vector<16x128xf32>
    %2 = arith.subf %0, %1 : vector<16x128xf32>
    %3 = arith.mulf %2, %2 : vector<16x128xf32>
    %4 = vector.shape_cast %3 : vector<16x128xf32> to vector<2x8x128xf32>
    %cst = arith.constant dense<0.000000e+00> : vector<8x128xf32>
    %5 = vector.multi_reduction <add>, %4, %cst [0] : vector<2x8x128xf32> to vector<8x128xf32>
    %c0_3 = arith.constant 0 : index
    %c0_4 = arith.constant 0 : index
    %6 = vector.load %arg3[%c0_3, %c0_4] : memref<8x128xf32, #tpu.memory_space<vmem>>, vector<8x128xf32>
    tpu.vector_store %arg3[%c0_3, %c0_4], %5 {strides = array<i32>} : memref<8x128xf32, #tpu.memory_space<vmem>>, vector<8x128xf32>,
    return
  }
  func.func @transform_0(%arg0: i32) -> (i32, i32) {
    %c0_i32 = arith.constant 0 : i32
    %c0_i32_0 = arith.constant 0 : i32
    return %arg0, %c0_i32 : i32, i32
  }
  func.func @transform_1(%arg0: i32) -> (i32, i32) {
    %c0_i32 = arith.constant 0 : i32
    %c0_i32_0 = arith.constant 0 : i32
    return %arg0, %c0_i32 : i32, i32
  }
  func.func @transform_2(%arg0: i32) -> (i32, i32) {
    %c0_i32 = arith.constant 0 : i32
    %c0_i32_0 = arith.constant 0 : i32
    return %arg0, %c0_i32 : i32, i32
  }
}

</mosaic_0001>

<bundles_post_ra>
// kernel: tpu_custom_call.1
= control target key start
LH: loop header
LB: loop body
LE: loop exit
PB: predicated region body
PF: predicated region fallthrough
CT: control target
= control target key end

     0   :  { %7 = vsyncpa [#allocation3], 0  ;;  %s184_s0 = inlined_call_operand.hbm [shape: f32[16,128], index: 0, kind: input, shape index: {}]   ;;  %s185_s1 = inlined_call_operand.hbm [shape: f32[16,128], index: 1, kind: input, shape index: {}]   ;;  %s186_s2 = inlined_call_operand.hbm [shape: f32[8,128], index: 2, kind: output, shape index: {}]  }
   0x1   :  { %8 = vsyncpa [#allocation6], 0 }
   0x2   :  { %9 = vsyncpa [#allocation4], 0  ;;  %s14_s11 = sshll.u32 %s184_s0, 4  ;;  %s155_s12 = smov [#allocation2]   ;;  %s15_s11 = int_to_ptr.hbm [resolvable:$true] %s14_s11 }
   0x3   :  { %s16_s13 = sshll.u32 %s155_s12, 4  ;;  %s27_s16 = sshll.u32 %s185_s1, 4  ;;  %s17_s13 = int_to_ptr.vmem [resolvable:$true] %s16_s13  ;;  %s28_s16 = int_to_ptr.hbm [resolvable:$true] %s27_s16 }
   0x4   :  { %s156_s17 = smov 128   ;;  %s157_s18 = smov 8  }
   0x5   :  { %22 = dma.hbm_to_vmem [thread:$0]  %s15_s11, 256, %s17_s13, [#allocation3], %s156_s17, %s156_s17, %s157_s18  }
   0x6   :  { %s158_s19 = smov [#allocation5]  }
   0x7   :  { %s29_s20 = sshll.u32 %s158_s19, 4  ;;  %s30_s20 = int_to_ptr.vmem [resolvable:$true] %s29_s20 }
   0x8   :  { %35 = dma.hbm_to_vmem [thread:$0]  %s28_s16, 256, %s30_s20, [#allocation6], %s156_s17, %s156_s17, %s157_s18  }
   0x9   :  { %149 = dma.done.wait [#allocation3], 256  }
   0xa   :  { %150 = vsyncadd [#allocation3], 4294967040 }
   0xb   :  { %151 = dma.done.wait [#allocation6], 256  }
   0xc   :  { %152 = vsyncadd [#allocation6], 4294967040  ;;  %v44_v0 = vld [vmem:[#allocation2] sm:$0xff]  ;;  %v45_v1 = vld [vmem:[#allocation2 + $0x8] sm:$0xff]  ;;  %s159_s0 = smov [#allocation7]   ;;  %s61_s23 = sshll.u32 %s186_s2, 4  ;;  %s62_s23 = int_to_ptr.hbm [resolvable:$true] %s61_s23 }
   0xd   :  { %v46_v2 = vld [vmem:[#allocation5] sm:$0xff]  ;;  %v47_v3 = vld [vmem:[#allocation5 + $0x8] sm:$0xff]  ;;  %s59_s1 = sshll.u32 %s159_s0, 4  ;;  %s60_s1 = int_to_ptr.vmem [resolvable:$true] %s59_s1 }
   0xe   :  { %v48_v4 = vsub.f32 %v44_v0, %v46_v2  ;;  %v49_v5 = vsub.f32 %v45_v1, %v47_v3 }
  0x10   :  { %v50_v6 = vmul.f32 %v48_v4, %v48_v4  ;;  %v51_v7 = vmul.f32 %v49_v5, %v49_v5 }
  0x12   :  { %v52_v8 = vadd.f32 %v51_v7, %v50_v6 }
  0x14   :  { %53 = vst [vmem:[#allocation7] sm:$0xff] %v52_v8 }
  0x15   :  { %64 = dma.vmem_to_hbm [thread:$0]  %s60_s1, 128, %s62_s23, [#allocation4]  }
  0x16   :  { %153 = dma.done.wait [#allocation4], 128  }
  0x17   :  { %154 = vsyncadd [#allocation4], 4294967168 }
  0x18   :  { %69 = vsyncpa [#allocation3], 1 }
  0x19   :  { %70 = vsyncpa [#allocation6], 1 }
  0x1a   :  { %71 = vsyncpa [#allocation4], 1 }

</bundles_post_ra>
